<compile_context>
chip_gen: v5e
topology: v5e:2x2
jax: 0.10.0
libtpu: 0.0.40
codegen_flags: <defaults>
</compile_context>

<pallas_src>
import functools
import math

import jax
import jax.numpy as jnp
from jax import lax
from jax.experimental import pallas as pl
from jax.experimental.pallas import tpu as pltpu

_LANE = 128
_MXU_REDUCE_MIN_ELEMS = 256 * 256   # offload LSE sums to the MXU above this size


def _power_transform(z, beta, d_valid):
    # torch: F.normalize(torch.pow(z + 1e-6, beta))  (p=2, dim=1, eps=1e-12)
    if float(beta) == 0.5:
        z = jnp.sqrt(z + 1e-6)                       # single EUP op
    else:
        z = jnp.exp(jnp.float32(beta) * jnp.log(z + 1e-6))
    if d_valid != z.shape[-1]:
        # Zero the lane padding added for lane-dense layout so it does not
        # perturb the row norms (padding of the raw input is exactly zero).
        lane = lax.broadcasted_iota(jnp.int32, z.shape, 1)
        z = jnp.where(lane < d_valid, z, 0.0)
    # x / max(||x||, 1e-12)  ==  x * rsqrt(max(||x||^2, 1e-24))
    inv_norm = lax.rsqrt(jnp.maximum(jnp.sum(z * z, axis=-1, keepdims=True), 1e-24))
    return z * inv_norm


def _ot_kernel(zs_ref, zq_ref, out_s_ref, *opt_out_q, eps, max_iter, thresh,
               beta, d_valid, check_every):
    zs = zs_ref[...].astype(jnp.float32)   # (ns, d_pad)  support features
    zq = zq_ref[...].astype(jnp.float32)   # (nq, d_pad)  query features
    ns = zs.shape[0]
    nq = zq.shape[0]

    if beta is not None:
        zs = _power_transform(zs, beta, d_valid)
        zq = _power_transform(zq, beta, d_valid)

    # ---- squared-L2 cost via MXU Gram matmul (contract feature dims directly,
    #      no transpose materialization, no (ns, nq, d) broadcast) -------------
    gram = lax.dot_general(zs, zq, dimension_numbers=(((1,), (1,)), ((), ())),
                           preferred_element_type=jnp.float32)          # (ns, nq)

    # Fused cost -> -C/eps: a single live (ns, nq) matrix, one mul + one clamp.
    # (The clamp only removes negative fp noise; torch leaves it in — benign,
    #  deliberate deviation.)
    if beta is not None:
        # rows are unit-norm after F.normalize -> ||a-b||^2 = 2 - 2 a.b
        neg_c_eps = jnp.minimum((gram - 1.0) * jnp.float32(2.0 / eps), 0.0)
    else:
        sn = jnp.sum(zs * zs, axis=-1, keepdims=True)                   # (ns, 1)
        qn = jnp.sum(zq * zq, axis=-1)[None, :]                         # (1, nq)
        neg_c_eps = jnp.minimum((2.0 * gram - sn - qn) * jnp.float32(1.0 / eps), 0.0)

    eps_f = jnp.float32(eps)
    thresh_f = jnp.float32(thresh)
    log_mu = jnp.float32(math.log(1.0 / ns + 1e-8))
    log_nu = jnp.float32(math.log(1.0 / nq + 1e-8))

    # Large episodes only: route the LSE / row sums through the otherwise-idle
    # MXU (the Sinkhorn loop has no matmuls).  Static Python gate -> the ones
    # matmuls are not even traced at small sizes.
    use_mxu_reduce = (ns * nq) >= _MXU_REDUCE_MIN_ELEMS
    ones_rows = jnp.ones((nq, 1), jnp.float32) if use_mxu_reduce else None
    ones_cols = jnp.ones((1, ns), jnp.float32) if use_mxu_reduce else None

    def lse_rows(m):   # logsumexp over last axis -> (ns, 1)
        mx = jnp.max(m, axis=-1, keepdims=True)
        e = jnp.exp(m - mx)
        if use_mxu_reduce:
            s = jnp.dot(e, ones_rows, preferred_element_type=jnp.float32)
        else:
            s = jnp.sum(e, axis=-1, keepdims=True)
        return mx + jnp.log(s)

    def lse_cols(m):   # logsumexp over first axis -> (1, nq)
        mx = jnp.max(m, axis=0, keepdims=True)
        e = jnp.exp(m - mx)
        if use_mxu_reduce:
            s = jnp.dot(ones_cols, e, preferred_element_type=jnp.float32)
        else:
            s = jnp.sum(e, axis=0, keepdims=True)
        return mx + jnp.log(s)

    # Log-domain Sinkhorn with eps-scaled duals (us = u/eps, vs = v/eps).
    # Instead of carrying (us, vs) and rebuilding neg_c_eps + us + vs twice per
    # iteration, carry M = neg_c_eps + us + vs and update it incrementally with
    # the dual increments; delta_u doubles as the err input.
    #   torch loop: update u, update v, err = |u_new - u|.sum(); break if < thresh.
    def one_pair(m):
        du = log_mu - lse_rows(m)                  # = us_new - us, (ns, 1)
        m = m + du
        dv = log_nu - lse_cols(m)                  # = vs_new - vs, (1, nq)
        m = m + dv
        return m, du

    def cond(carry):
        it, _, err = carry
        return jnp.logical_and(it < max_iter, err >= thresh_f)

    def body(carry):
        it, m, _ = carry
        du = None
        for _ in range(check_every):               # static unroll
            m, du = one_pair(m)
        # err in unscaled dual units: sum|u_new - u| = eps * sum|us_new - us|
        err = eps_f * jnp.sum(jnp.abs(du))
        return it + check_every, m, err

    init = (jnp.int32(0), neg_c_eps, jnp.float32(jnp.inf))
    _, m_final, _ = lax.while_loop(cond, body, init)

    # Transport plan and barycentric mapping:
    #   out = (pi / pi.sum(1, keepdims)) @ zq
    # Matmul first (MXU), then scale rows by an exact reciprocal of the row sums
    # (torch divides exactly -> approx=False for parity).
    pi = jnp.exp(m_final)                                               # (ns, nq)
    if use_mxu_reduce:
        rowsum = jnp.dot(pi, ones_rows, preferred_element_type=jnp.float32)
    else:
        rowsum = jnp.sum(pi, axis=1, keepdims=True)                     # (ns, 1)
    out = jnp.dot(pi, zq, preferred_element_type=jnp.float32)           # (ns, d_pad)
    out_s_ref[...] = out * pl.reciprocal(rowsum, approx=False)

    if beta is not None:
        # Query features were power-transformed in-kernel -> write them out.
        opt_out_q[0][...] = zq


def optimal_transport(z_support, z_query, *, regularization, max_iter,
                      stopping_criterion, power_transform=None,
                      convergence_check_every=4):
    """Returns (z_support_transported, z_query[possibly power-transformed])."""
    ns, d = z_support.shape
    nq, d2 = z_query.shape
    assert d == d2
    # NOTE: learn_regularization=True in torch only turns eps into an nn.Parameter
    # initialized to `regularization`; forward math is identical, so eps is constant.
    beta = power_transform if power_transform else None   # mirror `if self.beta:`

    # Amortized convergence check: clamp to the largest divisor of max_iter not
    # exceeding the request, so the kernel never runs more than max_iter
    # iterations.  check_every=1 reproduces torch's break point exactly.
    max_iter = int(max_iter)
    check_every = max(1, int(convergence_check_every))
    if max_iter > 0:
        while max_iter % check_every != 0:
            check_every -= 1

    # Lane-dense layout: zero-pad the feature dim to a multiple of 128 so the
    # feature matmuls and the output writeback are unmasked; padding is masked
    # in-kernel (power transform) and sliced off below.
    d_pad = -(-d // _LANE) * _LANE
    zs = z_support.astype(jnp.float32)
    zq = z_query.astype(jnp.float32)
    if d_pad != d:
        zs = jnp.pad(zs, ((0, 0), (0, d_pad - d)))
        zq = jnp.pad(zq, ((0, 0), (0, d_pad - d)))

    kernel = functools.partial(
        _ot_kernel,
        eps=float(regularization),
        max_iter=max_iter,
        thresh=float(stopping_criterion),
        beta=beta,
        d_valid=d,
        check_every=check_every,
    )

    # Explicit VMEM budget: a few (ns, nq) f32 live matrices + feature blocks,
    # with headroom; capped below v7x's 64 MiB physical VMEM (v5e/v6e have 2x).
    est = 4 * (6 * ns * nq + 4 * (ns + nq) * d_pad) + (4 << 20)
    vmem_limit = int(min(max(est, 32 << 20), 48 << 20))

    vmem_spec = pl.BlockSpec(memory_space=pltpu.MemorySpace.VMEM)

    if beta is not None:
        out_shape = (jax.ShapeDtypeStruct((ns, d_pad), jnp.float32),
                     jax.ShapeDtypeStruct((nq, d_pad), jnp.float32))
        out_specs = (vmem_spec, vmem_spec)
    else:
        # Query features are returned unmodified -> skip the redundant HBM writeback.
        out_shape = jax.ShapeDtypeStruct((ns, d_pad), jnp.float32)
        out_specs = vmem_spec

    # No grid: the kernel runs exactly once on whole arrays resident in VMEM
    # (no size-1-grid pipeline prologue/epilogue, no double-buffering).
    res = pl.pallas_call(
        kernel,
        out_shape=out_shape,
        in_specs=[vmem_spec, vmem_spec],
        out_specs=out_specs,
        compiler_params=pltpu.CompilerParams(vmem_limit_bytes=vmem_limit),
    )(zs, zq)

    if beta is not None:
        out_s, out_q = res
        return out_s[:, :d], out_q[:, :d]
    return res[:, :d], z_query.astype(jnp.float32)


if __name__ == "__main__":
    key = jax.random.PRNGKey(0)
    k1, k2 = jax.random.split(key)
    n_support, n_query, feat_dim = 8, 16, 32
    # Non-negative features (typical post-ReLU embeddings) so the power transform is valid.
    z_support = jax.random.uniform(k1, (n_support, feat_dim), dtype=jnp.float32)
    z_query = jax.random.uniform(k2, (n_query, feat_dim), dtype=jnp.float32)

    # With power transform (two kernel outputs, padded-lane masking path exercised).
    z_support_t, z_query_out = optimal_transport(
        z_support, z_query,
        regularization=0.05, max_iter=100, stopping_criterion=1e-4,
        power_transform=0.5,
    )
    jax.block_until_ready((z_support_t, z_query_out))

    # Without power transform (single kernel output, query returned as-is).
    z_support_t2, z_query_out2 = optimal_transport(
        z_support, z_query,
        regularization=0.05, max_iter=100, stopping_criterion=1e-4,
        power_transform=None,
    )
    jax.block_until_ready((z_support_t2, z_query_out2))
    print("KERNEL_OK")
</pallas_src>

<mosaic_0001>
module attributes {stable_mosaic.version = 11 : i64} {
  func.func @_ot_kernel(%arg0: memref<8x128xf32, #tpu.memory_space<vmem>>, %arg1: memref<16x128xf32, #tpu.memory_space<vmem>>, %arg2: memref<8x128xf32, #tpu.memory_space<vmem>>, %arg3: memref<16x128xf32, #tpu.memory_space<vmem>>) attributes {dimension_semantics = [], scalar_prefetch = 0 : i64, scratch_operands = 0 : i64, tpu.core_type = #tpu.core_type<tc>} {
    %c0 = arith.constant 0 : index
    %c0_0 = arith.constant 0 : index
    %0 = vector.load %arg0[%c0, %c0_0] : memref<8x128xf32, #tpu.memory_space<vmem>>, vector<8x128xf32>
    %c0_1 = arith.constant 0 : index
    %c0_2 = arith.constant 0 : index
    %1 = vector.load %arg1[%c0_1, %c0_2] : memref<16x128xf32, #tpu.memory_space<vmem>>, vector<16x128xf32>
    %cst = arith.constant 9.99999997E-7 : f32
    %2 = vector.broadcast %cst : f32 to vector<8x128xf32>
    %3 = arith.addf %0, %2 : vector<8x128xf32>
    %4 = math.sqrt %3 : vector<8x128xf32>
    %5 = tpu.iota {dimensions = array<i32: 1>} : vector<8x128xi32>
    %c32_i32 = arith.constant 32 : i32
    %6 = vector.broadcast %c32_i32 : i32 to vector<8x128xi32>
    %7 = arith.cmpi slt, %5, %6 : vector<8x128xi32>
    %cst_3 = arith.constant 0.000000e+00 : f32
    %8 = vector.broadcast %cst_3 : f32 to vector<8x128xf32>
    %9 = arith.select %7, %4, %8 : vector<8x128xi1>, vector<8x128xf32>
    %10 = arith.mulf %9, %9 : vector<8x128xf32>
    %cst_4 = arith.constant dense<0.000000e+00> : vector<8xf32>
    %11 = vector.multi_reduction <add>, %10, %cst_4 [1] : vector<8x128xf32> to vector<8xf32>
    %12 = vector.shape_cast %11 : vector<8xf32> to vector<8x1xf32>
    %cst_5 = arith.constant 1.000000e-24 : f32
    %13 = vector.broadcast %cst_5 : f32 to vector<8x1xf32>
    %14 = arith.maximumf %12, %13 : vector<8x1xf32>
    %15 = math.rsqrt %14 : vector<8x1xf32>
    %16 = vector.broadcast %15 : vector<8x1xf32> to vector<8x128xf32>
    %17 = arith.mulf %9, %16 : vector<8x128xf32>
    %cst_6 = arith.constant 9.99999997E-7 : f32
    %18 = vector.broadcast %cst_6 : f32 to vector<16x128xf32>
    %19 = arith.addf %1, %18 : vector<16x128xf32>
    %20 = math.sqrt %19 : vector<16x128xf32>
    %21 = tpu.iota {dimensions = array<i32: 1>} : vector<16x128xi32>
    %c32_i32_7 = arith.constant 32 : i32
    %22 = vector.broadcast %c32_i32_7 : i32 to vector<16x128xi32>
    %23 = arith.cmpi slt, %21, %22 : vector<16x128xi32>
    %cst_8 = arith.constant 0.000000e+00 : f32
    %24 = vector.broadcast %cst_8 : f32 to vector<16x128xf32>
    %25 = arith.select %23, %20, %24 : vector<16x128xi1>, vector<16x128xf32>
    %26 = arith.mulf %25, %25 : vector<16x128xf32>
    %cst_9 = arith.constant dense<0.000000e+00> : vector<16xf32>
    %27 = vector.multi_reduction <add>, %26, %cst_9 [1] : vector<16x128xf32> to vector<16xf32>
    %28 = vector.shape_cast %27 : vector<16xf32> to vector<16x1xf32>
    %cst_10 = arith.constant 1.000000e-24 : f32
    %29 = vector.broadcast %cst_10 : f32 to vector<16x1xf32>
    %30 = arith.maximumf %28, %29 : vector<16x1xf32>
    %31 = math.rsqrt %30 : vector<16x1xf32>
    %32 = vector.broadcast %31 : vector<16x1xf32> to vector<16x128xf32>
    %33 = arith.mulf %25, %32 : vector<16x128xf32>
    %cst_11 = arith.constant dense<0.000000e+00> : vector<8x16xf32>
    %34 = tpu.matmul %17, %33, %cst_11 {dimension_numbers = #tpu.dot_dimension_numbers<[1], [1], [0], [0], [0, 0, 1, 0], [], []>} : vector<8x128xf32>, vector<16x128xf32>, vector<8x16xf32> -> vector<8x16xf32>
    %cst_12 = arith.constant 1.000000e+00 : f32
    %35 = vector.broadcast %cst_12 : f32 to vector<8x16xf32>
    %36 = arith.subf %34, %35 : vector<8x16xf32>
    %cst_13 = arith.constant 4.000000e+01 : f32
    %37 = vector.broadcast %cst_13 : f32 to vector<8x16xf32>
    %38 = arith.mulf %36, %37 : vector<8x16xf32>
    %cst_14 = arith.constant 0.000000e+00 : f32
    %39 = vector.broadcast %cst_14 : f32 to vector<8x16xf32>
    %40 = arith.minimumf %38, %39 : vector<8x16xf32>
    %cst_15 = arith.constant 9.99999974E-5 : f32
    %cst_16 = arith.constant -2.07944155 : f32
    %cst_17 = arith.constant -2.77258849 : f32
    %cst_18 = arith.constant 5.000000e-02 : f32
    %c0_i32 = arith.constant 0 : i32
    %cst_19 = arith.constant 0x7F800000 : f32
    %41:3 = scf.while (%arg4 = %c0_i32, %arg5 = %40, %arg6 = %cst_19) : (i32, vector<8x16xf32>, f32) -> (i32, vector<8x16xf32>, f32) {
      %c100_i32 = arith.constant 100 : i32
      %51 = arith.cmpi slt, %arg4, %c100_i32 : i32
      %52 = arith.cmpf oge, %arg6, %cst_15 : f32
      %53 = arith.andi %51, %52 : i1
      scf.condition(%53) %arg4, %arg5, %arg6 : i32, vector<8x16xf32>, f32
    } do {
    ^bb0(%arg4: i32, %arg5: vector<8x16xf32>, %arg6: f32):
      %cst_26 = arith.constant dense<0xFF800000> : vector<8xf32>
      %51 = vector.multi_reduction <maximumf>, %arg5, %cst_26 [1] : vector<8x16xf32> to vector<8xf32>
      %52 = vector.shape_cast %51 : vector<8xf32> to vector<8x1xf32>
      %53 = vector.broadcast %52 : vector<8x1xf32> to vector<8x16xf32>
      %54 = arith.subf %arg5, %53 : vector<8x16xf32>
      %55 = math.exp %54 : vector<8x16xf32>
      %cst_27 = arith.constant dense<0.000000e+00> : vector<8xf32>
      %56 = vector.multi_reduction <add>, %55, %cst_27 [1] : vector<8x16xf32> to vector<8xf32>
      %57 = vector.shape_cast %56 : vector<8xf32> to vector<8x1xf32>
      %58 = math.log %57 : vector<8x1xf32>
      %59 = arith.addf %52, %58 : vector<8x1xf32>
      %60 = vector.broadcast %cst_16 : f32 to vector<8x1xf32>
      %61 = arith.subf %60, %59 : vector<8x1xf32>
      %62 = vector.broadcast %61 : vector<8x1xf32> to vector<8x16xf32>
      %63 = arith.addf %arg5, %62 : vector<8x16xf32>
      %cst_28 = arith.constant dense<0xFF800000> : vector<16xf32>
      %64 = vector.multi_reduction <maximumf>, %63, %cst_28 [0] : vector<8x16xf32> to vector<16xf32>
      %65 = vector.shape_cast %64 : vector<16xf32> to vector<1x16xf32>
      %66 = vector.broadcast %65 : vector<1x16xf32> to vector<8x16xf32>
      %67 = arith.subf %63, %66 : vector<8x16xf32>
      %68 = math.exp %67 : vector<8x16xf32>
      %cst_29 = arith.constant dense<0.000000e+00> : vector<16xf32>
      %69 = vector.multi_reduction <add>, %68, %cst_29 [0] : vector<8x16xf32> to vector<16xf32>
      %70 = vector.shape_cast %69 : vector<16xf32> to vector<1x16xf32>
      %71 = math.log %70 : vector<1x16xf32>
      %72 = arith.addf %65, %71 : vector<1x16xf32>
      %73 = vector.broadcast %cst_17 : f32 to vector<1x16xf32>
      %74 = arith.subf %73, %72 : vector<1x16xf32>
      %75 = vector.broadcast %74 : vector<1x16xf32> to vector<8x16xf32>
      %76 = arith.addf %63, %75 : vector<8x16xf32>
      %cst_30 = arith.constant dense<0xFF800000> : vector<8xf32>
      %77 = vector.multi_reduction <maximumf>, %76, %cst_30 [1] : vector<8x16xf32> to vector<8xf32>
      %78 = vector.shape_cast %77 : vector<8xf32> to vector<8x1xf32>
      %79 = vector.broadcast %78 : vector<8x1xf32> to vector<8x16xf32>
      %80 = arith.subf %76, %79 : vector<8x16xf32>
      %81 = math.exp %80 : vector<8x16xf32>
      %cst_31 = arith.constant dense<0.000000e+00> : vector<8xf32>
      %82 = vector.multi_reduction <add>, %81, %cst_31 [1] : vector<8x16xf32> to vector<8xf32>
      %83 = vector.shape_cast %82 : vector<8xf32> to vector<8x1xf32>
      %84 = math.log %83 : vector<8x1xf32>
      %85 = arith.addf %78, %84 : vector<8x1xf32>
      %86 = vector.broadcast %cst_16 : f32 to vector<8x1xf32>
      %87 = arith.subf %86, %85 : vector<8x1xf32>
      %88 = vector.broadcast %87 : vector<8x1xf32> to vector<8x16xf32>
      %89 = arith.addf %76, %88 : vector<8x16xf32>
      %cst_32 = arith.constant dense<0xFF800000> : vector<16xf32>
      %90 = vector.multi_reduction <maximumf>, %89, %cst_32 [0] : vector<8x16xf32> to vector<16xf32>
      %91 = vector.shape_cast %90 : vector<16xf32> to vector<1x16xf32>
      %92 = vector.broadcast %91 : vector<1x16xf32> to vector<8x16xf32>
      %93 = arith.subf %89, %92 : vector<8x16xf32>
      %94 = math.exp %93 : vector<8x16xf32>
      %cst_33 = arith.constant dense<0.000000e+00> : vector<16xf32>
      %95 = vector.multi_reduction <add>, %94, %cst_33 [0] : vector<8x16xf32> to vector<16xf32>
      %96 = vector.shape_cast %95 : vector<16xf32> to vector<1x16xf32>
      %97 = math.log %96 : vector<1x16xf32>
      %98 = arith.addf %91, %97 : vector<1x16xf32>
      %99 = vector.broadcast %cst_17 : f32 to vector<1x16xf32>
      %100 = arith.subf %99, %98 : vector<1x16xf32>
      %101 = vector.broadcast %100 : vector<1x16xf32> to vector<8x16xf32>
      %102 = arith.addf %89, %101 : vector<8x16xf32>
      %cst_34 = arith.constant dense<0xFF800000> : vector<8xf32>
      %103 = vector.multi_reduction <maximumf>, %102, %cst_34 [1] : vector<8x16xf32> to vector<8xf32>
      %104 = vector.shape_cast %103 : vector<8xf32> to vector<8x1xf32>
      %105 = vector.broadcast %104 : vector<8x1xf32> to vector<8x16xf32>
      %106 = arith.subf %102, %105 : vector<8x16xf32>
      %107 = math.exp %106 : vector<8x16xf32>
      %cst_35 = arith.constant dense<0.000000e+00> : vector<8xf32>
      %108 = vector.multi_reduction <add>, %107, %cst_35 [1] : vector<8x16xf32> to vector<8xf32>
      %109 = vector.shape_cast %108 : vector<8xf32> to vector<8x1xf32>
      %110 = math.log %109 : vector<8x1xf32>
      %111 = arith.addf %104, %110 : vector<8x1xf32>
      %112 = vector.broadcast %cst_16 : f32 to vector<8x1xf32>
      %113 = arith.subf %112, %111 : vector<8x1xf32>
      %114 = vector.broadcast %113 : vector<8x1xf32> to vector<8x16xf32>
      %115 = arith.addf %102, %114 : vector<8x16xf32>
      %cst_36 = arith.constant dense<0xFF800000> : vector<16xf32>
      %116 = vector.multi_reduction <maximumf>, %115, %cst_36 [0] : vector<8x16xf32> to vector<16xf32>
      %117 = vector.shape_cast %116 : vector<16xf32> to vector<1x16xf32>
      %118 = vector.broadcast %117 : vector<1x16xf32> to vector<8x16xf32>
      %119 = arith.subf %115, %118 : vector<8x16xf32>
      %120 = math.exp %119 : vector<8x16xf32>
      %cst_37 = arith.constant dense<0.000000e+00> : vector<16xf32>
      %121 = vector.multi_reduction <add>, %120, %cst_37 [0] : vector<8x16xf32> to vector<16xf32>
      %122 = vector.shape_cast %121 : vector<16xf32> to vector<1x16xf32>
      %123 = math.log %122 : vector<1x16xf32>
      %124 = arith.addf %117, %123 : vector<1x16xf32>
      %125 = vector.broadcast %cst_17 : f32 to vector<1x16xf32>
      %126 = arith.subf %125, %124 : vector<1x16xf32>
      %127 = vector.broadcast %126 : vector<1x16xf32> to vector<8x16xf32>
      %128 = arith.addf %115, %127 : vector<8x16xf32>
      %cst_38 = arith.constant dense<0xFF800000> : vector<8xf32>
      %129 = vector.multi_reduction <maximumf>, %128, %cst_38 [1] : vector<8x16xf32> to vector<8xf32>
      %130 = vector.shape_cast %129 : vector<8xf32> to vector<8x1xf32>
      %131 = vector.broadcast %130 : vector<8x1xf32> to vector<8x16xf32>
      %132 = arith.subf %128, %131 : vector<8x16xf32>
      %133 = math.exp %132 : vector<8x16xf32>
      %cst_39 = arith.constant dense<0.000000e+00> : vector<8xf32>
      %134 = vector.multi_reduction <add>, %133, %cst_39 [1] : vector<8x16xf32> to vector<8xf32>
      %135 = vector.shape_cast %134 : vector<8xf32> to vector<8x1xf32>
      %136 = math.log %135 : vector<8x1xf32>
      %137 = arith.addf %130, %136 : vector<8x1xf32>
      %138 = vector.broadcast %cst_16 : f32 to vector<8x1xf32>
      %139 = arith.subf %138, %137 : vector<8x1xf32>
      %140 = vector.broadcast %139 : vector<8x1xf32> to vector<8x16xf32>
      %141 = arith.addf %128, %140 : vector<8x16xf32>
      %cst_40 = arith.constant dense<0xFF800000> : vector<16xf32>
      %142 = vector.multi_reduction <maximumf>, %141, %cst_40 [0] : vector<8x16xf32> to vector<16xf32>
      %143 = vector.shape_cast %142 : vector<16xf32> to vector<1x16xf32>
      %144 = vector.broadcast %143 : vector<1x16xf32> to vector<8x16xf32>
      %145 = arith.subf %141, %144 : vector<8x16xf32>
      %146 = math.exp %145 : vector<8x16xf32>
      %cst_41 = arith.constant dense<0.000000e+00> : vector<16xf32>
      %147 = vector.multi_reduction <add>, %146, %cst_41 [0] : vector<8x16xf32> to vector<16xf32>
      %148 = vector.shape_cast %147 : vector<16xf32> to vector<1x16xf32>
      %149 = math.log %148 : vector<1x16xf32>
      %150 = arith.addf %143, %149 : vector<1x16xf32>
      %151 = vector.broadcast %cst_17 : f32 to vector<1x16xf32>
      %152 = arith.subf %151, %150 : vector<1x16xf32>
      %153 = vector.broadcast %152 : vector<1x16xf32> to vector<8x16xf32>
      %154 = arith.addf %141, %153 : vector<8x16xf32>
      %155 = math.absf %139 : vector<8x1xf32>
      %156 = vector.shape_cast %155 : vector<8x1xf32> to vector<1x8x1xf32>
      %cst_42 = arith.constant dense<0.000000e+00> : vector<1xf32>
      %157 = vector.multi_reduction <add>, %156, %cst_42 [1, 2] : vector<1x8x1xf32> to vector<1xf32>
      %158 = vector.shape_cast %157 : vector<1xf32> to vector<1x1x1xf32>
      %159 = vector.extract %158[0, 0, 0] : f32 from vector<1x1x1xf32>
      %160 = arith.mulf %cst_18, %159 : f32
      %c4_i32 = arith.constant 4 : i32
      %161 = arith.addi %arg4, %c4_i32 : i32
      scf.yield %161, %154, %160 : i32, vector<8x16xf32>, f32
    }
    %42 = math.exp %41#1 : vector<8x16xf32>
    %cst_20 = arith.constant dense<0.000000e+00> : vector<8xf32>
    %43 = vector.multi_reduction <add>, %42, %cst_20 [1] : vector<8x16xf32> to vector<8xf32>
    %44 = vector.shape_cast %43 : vector<8xf32> to vector<8x1xf32>
    %cst_21 = arith.constant dense<0.000000e+00> : vector<8x128xf32>
    %45 = tpu.matmul %42, %33, %cst_21 {dimension_numbers = #tpu.dot_dimension_numbers<[1], [0], [0], [1], [0, 0, 1, 1], [], []>} : vector<8x16xf32>, vector<16x128xf32>, vector<8x128xf32> -> vector<8x128xf32>
    %46 = tpu.reciprocal %44 : vector<8x1xf32> -> vector<8x1xf32>
    %47 = vector.broadcast %46 : vector<8x1xf32> to vector<8x128xf32>
    %48 = arith.mulf %45, %47 : vector<8x128xf32>
    %c0_22 = arith.constant 0 : index
    %c0_23 = arith.constant 0 : index
    %49 = vector.load %arg2[%c0_22, %c0_23] : memref<8x128xf32, #tpu.memory_space<vmem>>, vector<8x128xf32>
    tpu.vector_store %arg2[%c0_22, %c0_23], %48 {strides = array<i32>} : memref<8x128xf32, #tpu.memory_space<vmem>>, vector<8x128xf32>,
    %c0_24 = arith.constant 0 : index
    %c0_25 = arith.constant 0 : index
    %50 = vector.load %arg3[%c0_24, %c0_25] : memref<16x128xf32, #tpu.memory_space<vmem>>, vector<16x128xf32>
    tpu.vector_store %arg3[%c0_24, %c0_25], %33 {strides = array<i32>} : memref<16x128xf32, #tpu.memory_space<vmem>>, vector<16x128xf32>,
    return
  }
}

</mosaic_0001>

<bundles_post_ra>
// kernel: tpu_custom_call.1
= control target key start
LH: loop header
LB: loop body
LE: loop exit
PB: predicated region body
PF: predicated region fallthrough
CT: control target
= control target key end

     0   :  { %9 = vsyncpa [#allocation3], 0  ;;  %s706_s0 = inlined_call_operand.hbm [shape: f32[8,128], index: 0, kind: input, shape index: {}]   ;;  %s707_s1 = inlined_call_operand.hbm [shape: f32[16,128], index: 1, kind: input, shape index: {}]   ;;  %s708_s2 = inlined_call_operand.hbm [shape: f32[8,128], index: 2, kind: output, shape index: {0}]   ;;  %s709_s3 = inlined_call_operand.hbm [shape: f32[16,128], index: 3, kind: output, shape index: {1}]  }
   0x1   :  { %10 = vsyncpa [#allocation6], 0 }
   0x2   :  { %11 = vsyncpa [#allocation4], 0 }
   0x3   :  { %12 = vsyncpa [#allocation9], 0  ;;  %s18_s14 = sshll.u32 %s706_s0, 4  ;;  %s618_s15 = smov [#allocation2]   ;;  %s19_s14 = int_to_ptr.hbm [resolvable:$true] %s18_s14 }
   0x4   :  { %s20_s16 = sshll.u32 %s618_s15, 4  ;;  %s28_s19 = sshll.u32 %s707_s1, 4  ;;  %s21_s16 = int_to_ptr.vmem [resolvable:$true] %s20_s16  ;;  %s29_s19 = int_to_ptr.hbm [resolvable:$true] %s28_s19 }
   0x5   :  { %23 = dma.hbm_to_vmem [thread:$0]  %s19_s14, 128, %s21_s16, [#allocation3]  }
   0x6   :  { %s619_s20 = smov [#allocation5]   ;;  %s620_s22 = smov 128  }
   0x7   :  { %s30_s21 = sshll.u32 %s619_s20, 4  ;;  %s621_s23 = smov 8   ;;  %s31_s21 = int_to_ptr.vmem [resolvable:$true] %s30_s21 }
   0x8   :  { %36 = dma.hbm_to_vmem [thread:$0]  %s29_s19, 256, %s31_s21, [#allocation6], %s620_s22, %s620_s22, %s621_s23  }
   0x9   :  { %602 = dma.done.wait [#allocation3], 128  }
   0xa   :  { %603 = vsyncadd [#allocation3], 4294967168 }
   0xb   :  { %604 = dma.done.wait [#allocation6], 256  }
   0xc   :  { %605 = vsyncadd [#allocation6], 4294967040  ;;  %v45_v0 = vld [vmem:[#allocation2] sm:$0xff]  ;;  %v46_v1 = vld [vmem:[#allocation5] sm:$0xff]  ;;  %v61_v8 = vlaneseq  ;;  %s664_s0 = smov 0  }
   0xd   :  { %v47_v2 = vld [vmem:[#allocation5 + $0x8] sm:$0xff]  ;;  %v48_v3 = vadd.f32 1e-06, %v45_v0  ;;  %v80_v4 = vadd.f32 1e-06, %v46_v1 }
   0xe   :  { %v81_v5 = vadd.f32 1e-06, %v47_v2  ;;  %v62_v15 = vand.u32 127, %v61_v8 }
   0xf   :  { %vm56_vm3 = vcmp.eq.f32.partialorder %v48_v3, inf  ;;  %v59_v27 = vand.u32 2147483648, %v48_v3  ;;  %vm58_vm4 = vcmp.eq.f32.partialorder %v48_v3, 0.0  ;;  %vm89_vm5 = vcmp.eq.f32.partialorder %v80_v4, inf }
  0x10   :  { %450 = vrsqrt.f32 %v81_v5  ;;  %vm63_vm0 = vcmp.lt.s32.totalorder %v62_v15, 32  ;;  %vm101_vm1 = vcmp.eq.f32.partialorder %v81_v5, inf  ;;  %vm103_vm2 = vcmp.eq.f32.partialorder %v81_v5, 0.0 }
  0x11   :  { %452 = vrsqrt.f32 %v48_v3  ;;  %v104_v24 = vand.u32 2147483648, %v81_v5  ;;  %v92_v30 = vand.u32 2147483648, %v80_v4  ;;  %vm91_vm6 = vcmp.eq.f32.partialorder %v80_v4, 0.0 }
  0x12   :  { %454 = vrsqrt.f32 %v80_v4 }
  0x16   :  { %v451_v6 = vpop.eup %450 }
  0x17   :  { %v453_v7 = vpop.eup %452  ;;  %v95_v9 = vmul.f32 %v451_v6, %v81_v5 }
  0x18   :  { %v455_v10 = vpop.eup %454  ;;  %v50_v11 = vmul.f32 %v453_v7, %v48_v3 }
  0x19   :  { %v96_v12 = vmul.f32 %v451_v6, %v95_v9  ;;  %v83_v13 = vmul.f32 %v455_v10, %v80_v4 }
  0x1a   :  { %v51_v14 = vmul.f32 %v453_v7, %v50_v11 }
  0x1b   :  { %v97_v16 = vmul.f32 0.5, %v96_v12  ;;  %v84_v17 = vmul.f32 %v455_v10, %v83_v13 }
  0x1c   :  { %v52_v18 = vmul.f32 0.5, %v51_v14 }
  0x1d   :  { %v98_v19 = vsub.f32 1.5, %v97_v16  ;;  %v85_v20 = vmul.f32 0.5, %v84_v17 }
  0x1e   :  { %v53_v21 = vsub.f32 1.5, %v52_v18 }
  0x1f   :  { %v99_v22 = vmul.f32 %v451_v6, %v98_v19  ;;  %v86_v23 = vsub.f32 1.5, %v85_v20 }
  0x20   :  { %v54_v25 = vmul.f32 %v453_v7, %v53_v21 }
  0x21   :  { %v100_v26 = vmul.f32 %v99_v22, %v81_v5  ;;  %v87_v28 = vmul.f32 %v455_v10, %v86_v23 }
  0x22   :  { %v55_v29 = vmul.f32 %v54_v25, %v48_v3 }
  0x23   :  { %v102_v31 = vsel %vm101_vm1, %v81_v5, %v100_v26  ;;  %v88_v32 = vmul.f32 %v87_v28, %v80_v4 }
  0x24   :  { %v105_v33 = vsel %vm103_vm2, %v104_v24, %v102_v31  ;;  %v57_v34 = vsel %vm56_vm3, %v48_v3, %v55_v29 }
  0x25   :  { %v107_v35 = vsel %vm63_vm0, %v105_v33, 0.0  ;;  %v60_v36 = vsel %vm58_vm4, %v59_v27, %v57_v34  ;;  %v90_v37 = vsel %vm89_vm5, %v80_v4, %v88_v32 }
  0x26   :  { %v109_v38 = vmul.f32 %v107_v35, %v107_v35  ;;  %v64_v39 = vsel %vm63_vm0, %v60_v36, 0.0  ;;  %v93_v40 = vsel %vm91_vm6, %v92_v30, %v90_v37 }
  0x27   :  { %v65_v41 = vmul.f32 %v64_v39, %v64_v39  ;;  %v106_v42 = vsel %vm63_vm0, %v93_v40, 0.0 }
  0x28   :  { %112 = vadd.xlane.f32.xlu0 %v109_v38  ;;  %v108_v43 = vmul.f32 %v106_v42, %v106_v42 }
  0x29   :  { %66 = vadd.xlane.f32.xlu1 %v65_v41 }
  0x30   :  { %110 = vadd.xlane.f32.xlu0 %v108_v43 }
  0x9b   :  { %v113_v44 = vpop.xlane.xlu0 %112 }
  0x9c   :  { %v115_v45 = vmax.f32 %v113_v44, 1e-24  ;;  %v67_v46 = vpop.xlane.xlu1 %66 }
  0x9d   :  { %v68_v47 = vmax.f32 %v67_v46, 1e-24 }
  0x9e   :  { %456 = vrsqrt.f32 %v115_v45  ;;  %vm132_vm8 = vweird.f32 %v115_v45 }
  0x9f   :  { %458 = vrsqrt.f32 %v68_v47  ;;  %vm75_vm11 = vweird.f32 %v68_v47 }
  0xa3   :  { %v111_v48 = vpop.xlane.xlu0 %110 }
  0xa4   :  { %v457_v49 = vpop.eup %456  ;;  %v114_v50 = vmax.f32 %v111_v48, 1e-24 }
  0xa5   :  { %v459_v51 = vpop.eup %458  ;;  %v127_v52 = vmul.f32 %v457_v49, %v115_v45  ;;  %vm133_vm7 = vweird.f32 %v457_v49 }
  0xa6   :  { %v70_v53 = vmul.f32 %v459_v51, %v68_v47  ;;  %460 = vrsqrt.f32 %v114_v50  ;;  %vm134_vm9 = vmor %vm132_vm8, %vm133_vm7  ;;  %vm76_vm12 = vweird.f32 %v459_v51  ;;  %vm122_vm13 = vweird.f32 %v114_v50 }
  0xa7   :  { %v128_v54 = vmul.f32 %v457_v49, %v127_v52  ;;  %vm77_vm15 = vmor %vm75_vm11, %vm76_vm12 }
  0xa8   :  { %v71_v55 = vmul.f32 %v459_v51, %v70_v53 }
  0xa9   :  { %v129_v56 = vmul.f32 0.5, %v128_v54 }
  0xaa   :  { %v72_v59 = vmul.f32 0.5, %v71_v55 }
  0xab   :  { %v130_v57 = vsub.f32 1.5, %v129_v56 }
  0xac   :  { %v461_v58 = vpop.eup %460  ;;  %v73_v0 = vsub.f32 1.5, %v72_v59 }
  0xad   :  { %v117_v60 = vmul.f32 %v461_v58, %v114_v50  ;;  %v131_v61 = vmul.f32 %v457_v49, %v130_v57  ;;  %vm123_vm10 = vweird.f32 %v461_v58 }
  0xae   :  { %v74_v4 = vmul.f32 %v459_v51, %v73_v0  ;;  %vm124_vm14 = vmor %vm122_vm13, %vm123_vm10 }
  0xaf   :  { %v118_v62 = vmul.f32 %v461_v58, %v117_v60  ;;  %v135_v63 = vsel %vm134_vm9, %v457_v49, %v131_v61 }
  0xb0   :  { %v656_v1 = vmul.f32 %v135_v63, %v107_v35  ;;  %v78_v8 = vsel %vm77_vm15, %v459_v51, %v74_v4 }
  0xb1   :  { %v119_v2 = vmul.f32 0.5, %v118_v62  ;;  %v79_v9 = vmul.f32 %v78_v8, %v64_v39 }
  0xb2   :  { %152 = vmatpush.xpose.msra.mxu0 %v656_v1 }
  0xb3   :  { %v120_v3 = vsub.f32 1.5, %v119_v2 }
  0xb5   :  { %v121_v5 = vmul.f32 %v461_v58, %v120_v3 }
  0xb7   :  { %v125_v6 = vsel %vm124_vm14, %v461_v58, %v121_v5 }
  0xb8   :  { %v659_v7 = vmul.f32 %v125_v6, %v106_v42 }
  0xba   :  { %153 = vmatpush.xpose.msra.mxu0 %v659_v7 }
  0xbd   :  { %154 = vmatmul.f32.vlgmr.msra.gmra.mxu0 %v79_v9 }
 0x13a   :  { %v155_v10 = vpop.f32.mrf.mxu0 }
 0x13b   :  { %v424_v11 = vadd.f32 -1.0, %v155_v10 }
 0x13d   :  { %v159_v12 = vmul.f32 40.0, %v424_v11 }
 0x13f   :  { %v160_v13 = vmin.f32 %v159_v12, 0.0  }
 0x140 LB: > { %vm171_vm0 = vcmask 130048   ;;  %vm317_vm1 = vcmask 7168   ;;  %s329_s0 = sadd.s32 4, %s616_s0   ;;  %s616_s0 = sphi %s664_s0, %s329_s0   ;;  %v612_v13 = vphi %v160_v13, %v710_v13  }
 0x141   : > { %v172_v14 = vsel %vm171_vm0, %v612_v13, -inf  ;;  %p165_p0 = scmp.lt.s32.totalorder %s329_s0, 100 }
 0x142   : > { %173 = vmax.xlane.f32.xlu0 %v172_v14 }
 0x1b5   : > { %v174_v15 = vpop.xlane.xlu0 %173 }
 0x1b6   : > { %v175_v16 = vsub.f32 %v612_v13, %v174_v15 }
 0x1b8   : > { %v176_v17 = vmul.f32 1.442695, %v175_v16 }
 0x1ba   : > { %462 = vpow2.f32 %v176_v17 }
 0x1c0   : > { %v463_v18 = vpop.eup %462 }
 0x1c1   : > { %v178_v19 = vsel %vm171_vm0, %v463_v18, 0.0 }
 0x1c2   : > { %179 = vadd.xlane.f32.xlu0 %v178_v19 }
 0x235   : > { %v180_v20 = vpop.xlane.xlu0 %179 }
 0x236   : > { %464 = vlog2.f32 %v180_v20 }
 0x23c   : > { %v465_v21 = vpop.eup %464 }
 0x23d   : > { %v182_v22 = vmul.f32 0.6931472, %v465_v21 }
 0x23f   : > { %v183_v23 = vadd.f32 %v182_v22, %v174_v15 }
 0x241   : > { %v184_v24 = vsub.f32 -2.0794415, %v183_v23 }
 0x243   : > { %v185_v25 = vadd.f32 %v612_v13, %v184_v24 }
 0x245   : > { %v186_v26 = vsel %vm171_vm0, %v185_v25, -inf }
 0x246   : > { %v187_v27 = vrot.slane %v186_v26, 4 }
 0x248   : > { %v188_v28 = vmax.f32 %v186_v26, %v187_v27 }
 0x24a   : > { %v189_v29 = vrot.slane %v188_v28, 2 }
 0x24c   : > { %v190_v30 = vmax.f32 %v188_v28, %v189_v29 }
 0x24e   : > { %v191_v31 = vrot.slane %v190_v30, 1 }
 0x250   : > { %v192_v32 = vmax.f32 %v190_v30, %v191_v31 }
 0x252   : > { %v193_v33 = vsub.f32 %v185_v25, %v192_v32 }
 0x254   : > { %v194_v34 = vmul.f32 1.442695, %v193_v33 }
 0x256   : > { %466 = vpow2.f32 %v194_v34 }
 0x25c   : > { %v467_v35 = vpop.eup %466 }
 0x25d   : > { %v196_v36 = vsel %vm171_vm0, %v467_v35, 0.0 }
 0x25e   : > { %v197_v37 = vrot.slane %v196_v36, 4 }
 0x260   : > { %v198_v38 = vadd.f32 %v197_v37, %v196_v36 }
 0x262   : > { %v199_v39 = vrot.slane %v198_v38, 2 }
 0x264   : > { %v200_v40 = vadd.f32 %v199_v39, %v198_v38 }
 0x266   : > { %v201_v41 = vrot.slane %v200_v40, 1 }
 0x268   : > { %v202_v42 = vadd.f32 %v201_v41, %v200_v40 }
 0x26a   : > { %468 = vlog2.f32 %v202_v42 }
 0x270   : > { %v469_v43 = vpop.eup %468 }
 0x271   : > { %v204_v44 = vmul.f32 0.6931472, %v469_v43 }
 0x273   : > { %v205_v45 = vadd.f32 %v204_v44, %v192_v32 }
 0x275   : > { %v206_v46 = vsub.f32 -2.7725885, %v205_v45 }
 0x277   : > { %v207_v47 = vadd.f32 %v206_v46, %v185_v25 }
 0x279   : > { %v208_v48 = vsel %vm171_vm0, %v207_v47, -inf }
 0x27a   : > { %209 = vmax.xlane.f32.xlu1 %v208_v48 }
 0x2ed   : > { %v210_v49 = vpop.xlane.xlu1 %209 }
 0x2ee   : > { %v211_v50 = vsub.f32 %v207_v47, %v210_v49 }
 0x2f0   : > { %v212_v51 = vmul.f32 1.442695, %v211_v50 }
 0x2f2   : > { %470 = vpow2.f32 %v212_v51 }
 0x2f8   : > { %v471_v52 = vpop.eup %470 }
 0x2f9   : > { %v214_v53 = vsel %vm171_vm0, %v471_v52, 0.0 }
 0x2fa   : > { %215 = vadd.xlane.f32.xlu1 %v214_v53 }
 0x36d   : > { %v216_v54 = vpop.xlane.xlu1 %215 }
 0x36e   : > { %472 = vlog2.f32 %v216_v54 }
 0x374   : > { %v473_v55 = vpop.eup %472 }
 0x375   : > { %v218_v56 = vmul.f32 0.6931472, %v473_v55 }
 0x377   : > { %v219_v57 = vadd.f32 %v218_v56, %v210_v49 }
 0x379   : > { %v220_v58 = vsub.f32 -2.0794415, %v219_v57 }
 0x37b   : > { %v221_v59 = vadd.f32 %v220_v58, %v207_v47 }
 0x37d   : > { %v222_v60 = vsel %vm171_vm0, %v221_v59, -inf }
 0x37e   : > { %v223_v61 = vrot.slane %v222_v60, 4 }
 0x380   : > { %v224_v62 = vmax.f32 %v222_v60, %v223_v61 }
 0x382   : > { %v225_v63 = vrot.slane %v224_v62, 2 }
 0x384   : > { %v226_v0 = vmax.f32 %v224_v62, %v225_v63 }
 0x386   : > { %v227_v2 = vrot.slane %v226_v0, 1 }
 0x388   : > { %v228_v3 = vmax.f32 %v226_v0, %v227_v2 }
 0x38a   : > { %v229_v4 = vsub.f32 %v221_v59, %v228_v3 }
 0x38c   : > { %v230_v5 = vmul.f32 1.442695, %v229_v4 }
 0x38e   : > { %474 = vpow2.f32 %v230_v5 }
 0x394   : > { %v475_v6 = vpop.eup %474 }
 0x395   : > { %v232_v8 = vsel %vm171_vm0, %v475_v6, 0.0 }
 0x396   : > { %v233_v9 = vrot.slane %v232_v8, 4 }
 0x398   : > { %v234_v10 = vadd.f32 %v233_v9, %v232_v8 }
 0x39a   : > { %v235_v11 = vrot.slane %v234_v10, 2 }
 0x39c   : > { %v236_v12 = vadd.f32 %v235_v11, %v234_v10 }
 0x39e   : > { %v237_v13 = vrot.slane %v236_v12, 1 }
 0x3a0   : > { %v238_v14 = vadd.f32 %v237_v13, %v236_v12 }
 0x3a2   : > { %476 = vlog2.f32 %v238_v14 }
 0x3a8   : > { %v477_v15 = vpop.eup %476 }
 0x3a9   : > { %v240_v16 = vmul.f32 0.6931472, %v477_v15 }
 0x3ab   : > { %v241_v17 = vadd.f32 %v240_v16, %v228_v3 }
 0x3ad   : > { %v242_v18 = vsub.f32 -2.7725885, %v241_v17 }
 0x3af   : > { %v243_v19 = vadd.f32 %v242_v18, %v221_v59 }
 0x3b1   : > { %v244_v20 = vsel %vm171_vm0, %v243_v19, -inf }
 0x3b2   : > { %245 = vmax.xlane.f32.xlu2 %v244_v20 }
 0x425   : > { %v246_v21 = vpop.xlane.xlu2 %245 }
 0x426   : > { %v247_v22 = vsub.f32 %v243_v19, %v246_v21 }
 0x428   : > { %v248_v23 = vmul.f32 1.442695, %v247_v22 }
 0x42a   : > { %478 = vpow2.f32 %v248_v23 }
 0x430   : > { %v479_v24 = vpop.eup %478 }
 0x431   : > { %v250_v25 = vsel %vm171_vm0, %v479_v24, 0.0 }
 0x432   : > { %251 = vadd.xlane.f32.xlu2 %v250_v25 }
 0x4a5   : > { %v252_v26 = vpop.xlane.xlu2 %251 }
 0x4a6   : > { %480 = vlog2.f32 %v252_v26 }
 0x4ac   : > { %v481_v27 = vpop.eup %480 }
 0x4ad   : > { %v254_v28 = vmul.f32 0.6931472, %v481_v27 }
 0x4af   : > { %v255_v29 = vadd.f32 %v254_v28, %v246_v21 }
 0x4b1   : > { %v256_v30 = vsub.f32 -2.0794415, %v255_v29 }
 0x4b3   : > { %v257_v31 = vadd.f32 %v256_v30, %v243_v19 }
 0x4b5   : > { %v258_v32 = vsel %vm171_vm0, %v257_v31, -inf }
 0x4b6   : > { %v259_v33 = vrot.slane %v258_v32, 4 }
 0x4b8   : > { %v260_v34 = vmax.f32 %v258_v32, %v259_v33 }
 0x4ba   : > { %v261_v35 = vrot.slane %v260_v34, 2 }
 0x4bc   : > { %v262_v36 = vmax.f32 %v260_v34, %v261_v35 }
 0x4be   : > { %v263_v37 = vrot.slane %v262_v36, 1 }
 0x4c0   : > { %v264_v38 = vmax.f32 %v262_v36, %v263_v37 }
 0x4c2   : > { %v265_v39 = vsub.f32 %v257_v31, %v264_v38 }
 0x4c4   : > { %v266_v40 = vmul.f32 1.442695, %v265_v39 }
 0x4c6   : > { %482 = vpow2.f32 %v266_v40 }
 0x4cc   : > { %v483_v41 = vpop.eup %482 }
 0x4cd   : > { %v268_v42 = vsel %vm171_vm0, %v483_v41, 0.0 }
 0x4ce   : > { %v269_v43 = vrot.slane %v268_v42, 4 }
 0x4d0   : > { %v270_v44 = vadd.f32 %v269_v43, %v268_v42 }
 0x4d2   : > { %v271_v45 = vrot.slane %v270_v44, 2 }
 0x4d4   : > { %v272_v46 = vadd.f32 %v271_v45, %v270_v44 }
 0x4d6   : > { %v273_v47 = vrot.slane %v272_v46, 1 }
 0x4d8   : > { %v274_v48 = vadd.f32 %v273_v47, %v272_v46 }
 0x4da   : > { %484 = vlog2.f32 %v274_v48 }
 0x4e0   : > { %v485_v49 = vpop.eup %484 }
 0x4e1   : > { %v276_v50 = vmul.f32 0.6931472, %v485_v49 }
 0x4e3   : > { %v277_v51 = vadd.f32 %v276_v50, %v264_v38 }
 0x4e5   : > { %v278_v52 = vsub.f32 -2.7725885, %v277_v51 }
 0x4e7   : > { %v279_v53 = vadd.f32 %v278_v52, %v257_v31 }
 0x4e9   : > { %v280_v54 = vsel %vm171_vm0, %v279_v53, -inf }
 0x4ea   : > { %281 = vmax.xlane.f32.xlu0 %v280_v54 }
 0x55d   : > { %v282_v55 = vpop.xlane.xlu0 %281 }
 0x55e   : > { %v283_v56 = vsub.f32 %v279_v53, %v282_v55 }
 0x560   : > { %v284_v57 = vmul.f32 1.442695, %v283_v56 }
 0x562   : > { %486 = vpow2.f32 %v284_v57 }
 0x568   : > { %v487_v58 = vpop.eup %486 }
 0x569   : > { %v286_v59 = vsel %vm171_vm0, %v487_v58, 0.0 }
 0x56a   : > { %287 = vadd.xlane.f32.xlu1 %v286_v59 }
 0x5dd   : > { %v288_v60 = vpop.xlane.xlu1 %287 }
 0x5de   : > { %488 = vlog2.f32 %v288_v60 }
 0x5e4   : > { %v489_v61 = vpop.eup %488 }
 0x5e5   : > { %v290_v62 = vmul.f32 0.6931472, %v489_v61 }
 0x5e7   : > { %v291_v63 = vadd.f32 %v290_v62, %v282_v55 }
 0x5e9   : > { %v292_v0 = vsub.f32 -2.0794415, %v291_v63 }
 0x5eb   : > { %v293_v2 = vadd.f32 %v292_v0, %v279_v53  ;;  %v316_v3 = vand.u32 2147483647, %v292_v0 }
 0x5ed   : > { %v294_v4 = vsel %vm171_vm0, %v293_v2, -inf  ;;  %v318_v5 = vsel %vm317_vm1, %v316_v3, 0.0 }
 0x5ee   : > { %v295_v6 = vrot.slane %v294_v4, 4  ;;  %319 = vadd.xlane.f32.xlu2 %v318_v5 }
 0x5f0   : > { %v296_v8 = vmax.f32 %v294_v4, %v295_v6 }
 0x5f2   : > { %v297_v9 = vrot.slane %v296_v8, 2 }
 0x5f4   : > { %v298_v10 = vmax.f32 %v296_v8, %v297_v9 }
 0x5f6   : > { %v299_v11 = vrot.slane %v298_v10, 1 }
 0x5f8   : > { %v300_v12 = vmax.f32 %v298_v10, %v299_v11 }
 0x5fa   : > { %v301_v13 = vsub.f32 %v293_v2, %v300_v12 }
 0x5fc   : > { %v302_v14 = vmul.f32 1.442695, %v301_v13 }
 0x5fe   : > { %490 = vpow2.f32 %v302_v14 }
 0x604   : > { %v491_v15 = vpop.eup %490 }
 0x605   : > { %v304_v16 = vsel %vm171_vm0, %v491_v15, 0.0 }
 0x606   : > { %v305_v17 = vrot.slane %v304_v16, 4 }
 0x608   : > { %v306_v18 = vadd.f32 %v305_v17, %v304_v16 }
 0x60a   : > { %v307_v19 = vrot.slane %v306_v18, 2 }
 0x60c   : > { %v308_v20 = vadd.f32 %v307_v19, %v306_v18 }
 0x60e   : > { %v309_v21 = vrot.slane %v308_v20, 1 }
 0x610   : > { %v310_v22 = vadd.f32 %v309_v21, %v308_v20 }
 0x612   : > { %492 = vlog2.f32 %v310_v22 }
 0x618   : > { %v493_v23 = vpop.eup %492 }
 0x619   : > { %v312_v24 = vmul.f32 0.6931472, %v493_v23 }
 0x61b   : > { %v313_v25 = vadd.f32 %v312_v24, %v300_v12 }
 0x61d   : > { %v314_v26 = vsub.f32 -2.7725885, %v313_v25 }
 0x61f   : > { %v315_v27 = vadd.f32 %v314_v26, %v293_v2  }
 0x621   : > { %v710_v13 = vmov %v315_v27 }
 0x661   : > { %v320_v28 = vpop.xlane.xlu2 %319 }
 0x662   : > { %v321_v29 = vrot.slane %v320_v28, 4 }
 0x664   : > { %v322_v30 = vadd.f32 %v321_v29, %v320_v28 }
 0x666   : > { %v323_v31 = vrot.slane %v322_v30, 2 }
 0x668   : > { %v324_v32 = vadd.f32 %v323_v31, %v322_v30 }
 0x66a   : > { %v325_v33 = vrot.slane %v324_v32, 1 }
 0x66c   : > { %v326_v34 = vadd.f32 %v325_v33, %v324_v32 }
 0x66e   : > { %426 = vpush %v326_v34 }
 0x69f   : > { %s427_s1 = spop %426 }
 0x6a0   : > { %s328_s24 = smul.f32 0.05, %s427_s1 }
 0x6a2   : > { %p166_p1 = scmp.ge.f32.partialorder %s328_s24, 0.0001 }
 0x6a4   : > { %p167_p2 = pnand %p166_p1, %p165_p0 }
 0x6a5   :  { %v330_v35 = vmul.f32 (%p167_p2), 1.442695, %v315_v27  ;;  %353 = vmatpush.msra.mxu1 (%p167_p2), %v656_v1  ;;  %375 = vst [vmem:[#allocation8] sm:$0xff] (%p167_p2), %v659_v7  ;;  %s622_s25 = smov (%p167_p2), [#allocation8]   ;;  %s394_s29 = sshll.u32 (%p167_p2), %s709_s3, 4  ;;  %s395_s29 = int_to_ptr.hbm [resolvable:$true] %s394_s29 }
 0x6a6   :  { %170 = sbr.rel (!%p167_p2) target bundleno = 320 (0x140), region = 51  ;;  %376 = vst [vmem:[#allocation8 + $0x8] sm:$0xff] (%p167_p2), %v656_v1  ;;  %s392_s26 = sshll.u32 (%p167_p2), %s622_s25, 4  ;;  %s393_s26 = int_to_ptr.vmem [resolvable:$true] %s392_s26 }
 0x6a7   :  { %494 = vpow2.f32 (%p167_p2), %v330_v35  ;;  %354 = vmatpush.msra.mxu1 (%p167_p2), %v659_v7  ;;  %400 = dma.vmem_to_hbm [thread:$0]  (%p167_p2), %s393_s26, 256, %s395_s29, [#allocation9], %s620_s22, %s620_s22, %s621_s23  }
 0x6a8   :  { %s623_s3 = smov (%p167_p2), [#allocation7]   ;;  %s384_s6 = sshll.u32 (%p167_p2), %s708_s2, 4  ;;  %s385_s6 = int_to_ptr.hbm [resolvable:$true] %s384_s6 }
 0x6a9   :  { %s382_s30 = sshll.u32 (%p167_p2), %s623_s3, 4  ;;  %s383_s30 = int_to_ptr.vmem [resolvable:$true] %s382_s30 }
 0x6ad   :  { %v495_v36 = vpop.eup %494 }
 0x6ae   :  { %v333_v37 = vsel %vm171_vm0, %v495_v36, 0.0  ;;  %425 = vmatmul.msk.f32.vlgmr.msra.gmra.mxu1 %vm171_vm0, %v495_v36 }
 0x6af   :  { %334 = vadd.xlane.f32.xlu0 %v333_v37 }
 0x722   :  { %v335_v1 = vpop.xlane.xlu0 %334 }
 0x723   :  { %496 = vrcp.f32 %v335_v1  ;;  %v370_v40 = vand.u32 2147483648, %v335_v1  ;;  %v368_v42 = vand.u32 2147483647, %v335_v1  ;;  %vm364_vm3 = vweird.f32 %v335_v1 }
 0x725   :  { %v371_v45 = vor.u32 1.1754944e-38, %v370_v40  ;;  %vm369_vm5 = vcmp.eq.f32.partialorder %v368_v42, 8.507059e+37 }
 0x729   :  { %v497_v7 = vpop.eup %496 }
 0x72a   :  { %v360_v38 = vmul.f32 %v497_v7, %v335_v1  ;;  %vm365_vm2 = vweird.f32 %v497_v7 }
 0x72b   :  { %v356_v44 = vpop.f32.mrf.mxu1  ;;  %vm366_vm4 = vmor %vm364_vm3, %vm365_vm2 }
 0x72c   :  { %v361_v39 = vsub.f32 1.0, %v360_v38 }
 0x72e   :  { %v362_v41 = vmul.f32 %v497_v7, %v361_v39 }
 0x730   :  { %v363_v43 = vadd.f32 %v497_v7, %v362_v41 }
 0x732   :  { %v367_v46 = vsel %vm366_vm4, %v497_v7, %v363_v43 }
 0x733   :  { %v372_v47 = vsel %vm369_vm5, %v371_v45, %v367_v46 }
 0x734   :  { %v373_v48 = vmul.f32 %v372_v47, %v356_v44 }
 0x736   :  { %374 = vst [vmem:[#allocation7] sm:$0xff] %v373_v48 }
 0x737   :  { %387 = dma.vmem_to_hbm [thread:$0]  %s383_s30, 128, %s385_s6, [#allocation4]  }
 0x738   :  { %606 = dma.done.wait [#allocation4], 128  }
 0x739   :  { %607 = vsyncadd [#allocation4], 4294967168 }
 0x73a   :  { %608 = dma.done.wait [#allocation9], 256  }
 0x73b   :  { %609 = vsyncadd [#allocation9], 4294967040 }
 0x73c   :  { %409 = vsyncpa [#allocation3], 1 }
 0x73d   :  { %410 = vsyncpa [#allocation6], 1 }
 0x73e   :  { %411 = vsyncpa [#allocation4], 1 }
 0x73f   :  { %412 = vsyncpa [#allocation9], 1 }

</bundles_post_ra>
